<compile_context>
chip_gen: v7x
topology: tpu7x:2x2x1
jax: 0.10.0
libtpu: 0.0.40
codegen_flags: <defaults>
</compile_context>

<pallas_src>
import itertools

import jax
import jax.numpy as jnp
from jax.experimental import pallas as pl
from jax.experimental.pallas import tpu as pltpu


class SumJunctionConfig:
    """Mirrors SumJunction.__init__ (pure Python, no parameters)."""

    def __init__(self, index, settings):
        for i in range(index, -1, -1):
            start_index = i
            if settings[i][2] != 1:
                break
        inbounds = [index]
        for i in itertools.count():
            inbound_index = index - 2 ** (i + 1) + 1
            if inbound_index < start_index:
                break
            inbounds.append(inbound_index)
        self.index = index
        self.inbounds = inbounds
        self.channels = settings[index][1]
        self.paddings = [settings[index][1] - settings[i][1] for i in inbounds]


# ----------------------------------------------------------------------------
# Small integer helpers (host-side, static).
# ----------------------------------------------------------------------------
def _cdiv(a, b):
    return -(-a // b)


def _round_up(x, m):
    return _cdiv(x, m) * m


def _round_down(x, m):
    return (x // m) * m


def _tpu_vmem_capacity_bytes():
    """Physical VMEM per TensorCore; conservative fallback if unavailable."""
    try:
        info = pltpu.get_tpu_info()
        cap = getattr(info, "vmem_capacity_bytes", None)
        if cap:
            return int(cap)
    except Exception:
        pass
    return 64 * 1024 * 1024  # v7x per-TC VMEM (smallest of the targets)


# ----------------------------------------------------------------------------
# Channel bands.
#
# Inbound tensor j covers output rows [0, c_j); rows [c_j, C) receive only y
# (the implicit zero pad).  Band edges include round_down/round_up(c_j, sub)
# and c_j itself, so every band is either fully covered or not covered by each
# inbound, the bulk of the rows live in sublane-aligned bands, and any masked
# partial load/store is confined to thin (< sub rows) bands around unaligned
# channel counts.
# ----------------------------------------------------------------------------
def _channel_bands(in_channels, out_channels, sub):
    edges = set()
    for c in in_channels:
        if 0 < c <= out_channels:
            edges.add(c)
            edges.add(min(_round_down(c, sub), out_channels))
            edges.add(min(_round_up(c, sub), out_channels))
    edges.discard(0)
    edges.add(out_channels)

    bands = []
    lo = 0
    for hi in sorted(edges):
        if hi <= lo:
            continue
        idxs = tuple(j for j, c in enumerate(in_channels) if c >= hi)
        bands.append((lo, hi, idxs))
        lo = hi
    return tuple(bands)


def _make_sum_junction_kernel(bands, acc_dtype, out_dtype):
    """Kernel body for a fixed (static) band structure.

    Refs are 2-D (channels, lane_tile).  Each output band is accumulated in
    registers (acc_dtype) and stored exactly once; dtype casts happen here on
    the VPU rather than in the wrapper.
    """

    def kernel(y_ref, *rest):
        x_refs = rest[:-1]
        o_ref = rest[-1]
        for lo, hi, idxs in bands:
            acc = y_ref[lo:hi, :].astype(acc_dtype)
            for j in idxs:
                acc = acc + x_refs[j][lo:hi, :].astype(acc_dtype)
            o_ref[lo:hi, :] = acc.astype(out_dtype)

    return kernel


# ----------------------------------------------------------------------------
# Lane-tile selection: sized by bytes per grid step, clamped by the VMEM
# budget, multiple of 128 (need not divide L), and split further if the grid
# would otherwise be too small to feed both v7x TensorCores / the DMA pipeline.
# ----------------------------------------------------------------------------
def _choose_lane_tile(L, N, per_lane_bytes, vmem_budget_bytes,
                      target_step_bytes, min_grid_steps=4):
    if L <= 256:
        tl = L  # full-extent lane block is always legal
    else:
        # Double-buffered working set must fit the budget.
        max_tl = max(128, _round_down(vmem_budget_bytes // (2 * per_lane_bytes), 128))
        # Move enough HBM bytes per step to amortize the fixed per-step cost.
        tgt_tl = max(128, _round_up(_cdiv(target_step_bytes, per_lane_bytes), 128))
        tl = min(max_tl, tgt_tl, max(128, _round_down(L, 128)))

    # Best effort: guarantee >= min_grid_steps total grid steps so megacore
    # sharding (v7x: 2 TCs) and cross-step DMA overlap actually happen.
    if N * _cdiv(L, tl) < min_grid_steps and L > 128:
        want_blocks = min(_cdiv(min_grid_steps, N), _cdiv(L, 128))
        tl_split = max(128, _round_down(_cdiv(L, want_blocks), 128))
        tl = min(tl, tl_split)
    return tl


# ----------------------------------------------------------------------------
# Forward.
# ----------------------------------------------------------------------------
def sum_junction_forward(cfg, y, xs, *, donate_y=False,
                         vmem_working_set_bytes=None,
                         target_step_bytes=8 * 1024 * 1024):
    """Pallas forward.  y: (N, C, H, W).  xs: list of NCHW tensors (indexed by
    cfg.inbounds, each with channels <= C and the same N/H/W)."""
    N, C, H, W = y.shape
    L = H * W

    y3 = y.reshape(N, C, L)
    x_in = []
    for i, p in zip(cfg.inbounds, cfg.paddings):
        xi = xs[i]
        assert xi.shape[0] == N and xi.shape[2] == H and xi.shape[3] == W
        assert xi.shape[1] + p == C
        x_in.append(xi.reshape(N, xi.shape[1], L))  # NO wrapper-side cast
    in_channels = tuple(x.shape[1] for x in x_in)
    total_in_ch = sum(in_channels)

    # Output dtype follows numpy/torch-style promotion; accumulate floats in f32.
    out_dtype = jnp.result_type(y.dtype, *(x.dtype for x in x_in))
    if jnp.issubdtype(out_dtype, jnp.floating):
        acc_dtype = jnp.promote_types(out_dtype, jnp.float32)
    else:
        acc_dtype = out_dtype

    itemsize = lambda dt: jnp.dtype(dt).itemsize
    per_lane_bytes = (itemsize(y.dtype) * C + itemsize(out_dtype) * C
                      + sum(itemsize(x.dtype) * c for x, c in zip(x_in, in_channels)))

    # Generation-aware VMEM budgets (v7x: 64 MiB VMEM; v5e/v6e: 128 MiB).
    vmem_cap = _tpu_vmem_capacity_bytes()
    if vmem_working_set_bytes is None:
        vmem_working_set_bytes = vmem_cap // 2  # 32 MiB on v7x, 64 MiB on v5e/v6e

    TL = _choose_lane_tile(L, N, per_lane_bytes, vmem_working_set_bytes,
                           target_step_bytes)
    n_lane_blocks = pl.cdiv(L, TL)

    # Sublane tile for the output dtype: 8 rows f32 / 16 bf16 / 32 int8-fp8.
    sub = max(1, 32 // itemsize(out_dtype))
    bands = _channel_bands(in_channels, C, sub)
    kernel = _make_sum_junction_kernel(bands, acc_dtype, out_dtype)

    # Squeezed leading batch dim -> 2-D kernel refs (None is the equivalent
    # legacy spelling, kept as a compatibility fallback).
    sq = pl.Squeezed() if hasattr(pl, "Squeezed") else None
    idx_map = lambda n, l: (n, 0, l)
    in_specs = [pl.BlockSpec((sq, C, TL), idx_map)]
    for c in in_channels:
        in_specs.append(pl.BlockSpec((sq, c, TL), idx_map))
    out_spec = pl.BlockSpec((sq, C, TL), idx_map)

    # Explicit VMEM limit: enough for the double-buffered blocks plus headroom,
    # at least 32 MiB (v5e scoped default is only 16 MiB), and clamped well
    # below physical VMEM (<= ~56 MiB on v7x).
    block_bytes = per_lane_bytes * TL
    vmem_limit = max(32 << 20, 2 * block_bytes + (4 << 20))
    vmem_limit = min(vmem_limit, (vmem_cap * 7) // 8)

    cost = pl.CostEstimate(
        flops=int(N * L * total_in_ch),
        transcendentals=0,
        bytes_accessed=int(N * L * per_lane_bytes),
    )

    # Alias y -> out only when the caller guarantees y is dead after this op
    # (and dtypes match); default off to avoid the donation foot-gun.
    alias = {0: 0} if (donate_y and out_dtype == y.dtype) else {}

    out3 = pl.pallas_call(
        kernel,
        out_shape=jax.ShapeDtypeStruct((N, C, L), out_dtype),
        grid=(N, n_lane_blocks),
        in_specs=in_specs,
        out_specs=out_spec,
        compiler_params=pltpu.CompilerParams(
            dimension_semantics=("parallel", "parallel"),
            vmem_limit_bytes=int(vmem_limit),
        ),
        cost_estimate=cost,
        input_output_aliases=alias,
    )(y3, *x_in)
    return out3.reshape(N, C, H, W)


# ----------------------------------------------------------------------------
# Pure-JAX reference (matches the PyTorch forward) and tests.
# ----------------------------------------------------------------------------
def sum_junction_reference(cfg, y, xs):
    padded = []
    for i, p in zip(cfg.inbounds, cfg.paddings):
        xi = xs[i]
        if p != 0:
            xi = jnp.pad(xi, ((0, 0), (0, p), (0, 0), (0, 0)))
        padded.append(xi)
    if len(cfg.inbounds) == 1:
        return y + padded[0]
    return y + jnp.stack(padded, axis=1).sum(axis=1)


def _run_case(cfg, settings, N, H, W, key, dtype=jnp.float32, **fwd_kwargs):
    C = cfg.channels
    ky, *kxs = jax.random.split(key, 1 + len(settings))
    y = jax.random.normal(ky, (N, C, H, W), dtype=jnp.float32).astype(dtype)
    xs = [
        jax.random.normal(kxs[i], (N, settings[i][1], H, W), dtype=jnp.float32).astype(dtype)
        for i in range(len(settings))
    ]
    out = jax.block_until_ready(sum_junction_forward(cfg, y, xs, **fwd_kwargs))
    ref = sum_junction_reference(
        cfg, y.astype(jnp.float32), [x.astype(jnp.float32) for x in xs])
    assert out.shape == (N, C, H, W)
    if dtype == jnp.float32:
        atol = rtol = 1e-5
    else:
        atol = rtol = 1e-2
    assert jnp.allclose(out.astype(jnp.float32), ref, atol=atol, rtol=rtol), \
        "mismatch vs reference"


if __name__ == "__main__":
    key = jax.random.PRNGKey(0)
    k0, k1, k2, k3 = jax.random.split(key, 4)

    # Case 1: 3 inbounds with channel padding (inbounds=[3,2,0], paddings=[0,4,8]);
    # L=256 forces the lane-split path (grid=(2,2)) for megacore/pipelining.
    settings = [(3, 8, 1), (3, 8, 1), (3, 12, 1), (3, 16, 1)]
    cfg = SumJunctionConfig(3, settings)
    _run_case(cfg, settings, N=2, H=16, W=16, key=k0)

    # Case 2: awkward spatial size (L=400, not a multiple of 128) exercises the
    # non-dividing lane tile with a masked final block.
    _run_case(cfg, settings, N=2, H=20, W=20, key=k1)

    # Case 3: single-inbound path (stride breaks the chain), no padding.
    settings_s = [(3, 4, 2), (3, 8, 2)]
    cfg_s = SumJunctionConfig(1, settings_s)  # inbounds=[1], paddings=[0]
    _run_case(cfg_s, settings_s, N=2, H=16, W=16, key=k2)

    # Case 4: bfloat16 inputs exercise the in-kernel cast + f32 accumulation
    # and the 16-row sublane band alignment.
    _run_case(cfg, settings, N=2, H=16, W=16, key=k3, dtype=jnp.bfloat16)

    print("KERNEL_OK")
</pallas_src>

<mosaic_0001>
module attributes {stable_mosaic.version = 11 : i64} {
  func.func @kernel(%arg0: i32, %arg1: i32, %arg2: memref<1x16x128xf32, #tpu.memory_space<vmem>>, %arg3: memref<1x16x128xf32, #tpu.memory_space<vmem>>, %arg4: memref<1x12x128xf32, #tpu.memory_space<vmem>>, %arg5: memref<1x8x128xf32, #tpu.memory_space<vmem>>, %arg6: memref<1x16x128xf32, #tpu.memory_space<vmem>>) attributes {dimension_semantics = [#tpu.dimension_semantics<parallel>, #tpu.dimension_semantics<parallel>], iteration_bounds = array<i64: 2, 2>, scalar_prefetch = 0 : i64, scratch_operands = 0 : i64, tpu.core_type = #tpu.core_type<tc>, window_params = [{transform_indices = @transform_0, window_bounds = array<i64: 1, 16, 128>}, {transform_indices = @transform_1, window_bounds = array<i64: 1, 16, 128>}, {transform_indices = @transform_2, window_bounds = array<i64: 1, 12, 128>}, {transform_indices = @transform_3, window_bounds = array<i64: 1, 8, 128>}, {transform_indices = @transform_4, window_bounds = array<i64: 1, 16, 128>}]} {
    %c0 = arith.constant 0 : index
    %c0_0 = arith.constant 0 : index
    %c0_1 = arith.constant 0 : index
    %0 = vector.load %arg2[%c0, %c0_0, %c0_1] : memref<1x16x128xf32, #tpu.memory_space<vmem>>, vector<1x8x128xf32>
    %1 = vector.shape_cast %0 : vector<1x8x128xf32> to vector<8x128xf32>
    %c0_2 = arith.constant 0 : index
    %c0_3 = arith.constant 0 : index
    %c0_4 = arith.constant 0 : index
    %2 = vector.load %arg3[%c0_2, %c0_3, %c0_4] : memref<1x16x128xf32, #tpu.memory_space<vmem>>, vector<1x8x128xf32>
    %3 = vector.shape_cast %2 : vector<1x8x128xf32> to vector<8x128xf32>
    %4 = arith.addf %1, %3 : vector<8x128xf32>
    %c0_5 = arith.constant 0 : index
    %c0_6 = arith.constant 0 : index
    %c0_7 = arith.constant 0 : index
    %5 = vector.load %arg4[%c0_5, %c0_6, %c0_7] : memref<1x12x128xf32, #tpu.memory_space<vmem>>, vector<1x8x128xf32>
    %6 = vector.shape_cast %5 : vector<1x8x128xf32> to vector<8x128xf32>
    %7 = arith.addf %4, %6 : vector<8x128xf32>
    %c0_8 = arith.constant 0 : index
    %c0_9 = arith.constant 0 : index
    %c0_10 = arith.constant 0 : index
    %8 = vector.load %arg5[%c0_8, %c0_9, %c0_10] : memref<1x8x128xf32, #tpu.memory_space<vmem>>, vector<1x8x128xf32>
    %9 = vector.shape_cast %8 : vector<1x8x128xf32> to vector<8x128xf32>
    %10 = arith.addf %7, %9 : vector<8x128xf32>
    %c0_11 = arith.constant 0 : index
    %c0_12 = arith.constant 0 : index
    %c0_13 = arith.constant 0 : index
    %11 = vector.load %arg6[%c0_11, %c0_12, %c0_13] : memref<1x16x128xf32, #tpu.memory_space<vmem>>, vector<1x8x128xf32>
    %12 = vector.shape_cast %11 : vector<1x8x128xf32> to vector<8x128xf32>
    %13 = vector.shape_cast %10 : vector<8x128xf32> to vector<1x8x128xf32>
    tpu.vector_store %arg6[%c0_11, %c0_12, %c0_13], %13 {strides = array<i32>} : memref<1x16x128xf32, #tpu.memory_space<vmem>>, vector<1x8x128xf32>,
    %c0_14 = arith.constant 0 : index
    %c8 = arith.constant 8 : index
    %c0_15 = arith.constant 0 : index
    %14 = vector.load %arg2[%c0_14, %c8, %c0_15] : memref<1x16x128xf32, #tpu.memory_space<vmem>>, vector<1x4x128xf32>
    %15 = vector.shape_cast %14 : vector<1x4x128xf32> to vector<4x128xf32>
    %c0_16 = arith.constant 0 : index
    %c8_17 = arith.constant 8 : index
    %c0_18 = arith.constant 0 : index
    %16 = vector.load %arg3[%c0_16, %c8_17, %c0_18] : memref<1x16x128xf32, #tpu.memory_space<vmem>>, vector<1x4x128xf32>
    %17 = vector.shape_cast %16 : vector<1x4x128xf32> to vector<4x128xf32>
    %18 = arith.addf %15, %17 : vector<4x128xf32>
    %c0_19 = arith.constant 0 : index
    %c8_20 = arith.constant 8 : index
    %c0_21 = arith.constant 0 : index
    %19 = vector.load %arg4[%c0_19, %c8_20, %c0_21] : memref<1x12x128xf32, #tpu.memory_space<vmem>>, vector<1x4x128xf32>
    %20 = vector.shape_cast %19 : vector<1x4x128xf32> to vector<4x128xf32>
    %21 = arith.addf %18, %20 : vector<4x128xf32>
    %c0_22 = arith.constant 0 : index
    %c8_23 = arith.constant 8 : index
    %c0_24 = arith.constant 0 : index
    %22 = vector.load %arg6[%c0_22, %c8_23, %c0_24] : memref<1x16x128xf32, #tpu.memory_space<vmem>>, vector<1x4x128xf32>
    %23 = vector.shape_cast %22 : vector<1x4x128xf32> to vector<4x128xf32>
    %24 = vector.shape_cast %21 : vector<4x128xf32> to vector<1x4x128xf32>
    tpu.vector_store %arg6[%c0_22, %c8_23, %c0_24], %24 {strides = array<i32>} : memref<1x16x128xf32, #tpu.memory_space<vmem>>, vector<1x4x128xf32>,
    %c0_25 = arith.constant 0 : index
    %c12 = arith.constant 12 : index
    %c0_26 = arith.constant 0 : index
    %25 = vector.load %arg2[%c0_25, %c12, %c0_26] : memref<1x16x128xf32, #tpu.memory_space<vmem>>, vector<1x4x128xf32>
    %26 = vector.shape_cast %25 : vector<1x4x128xf32> to vector<4x128xf32>
    %c0_27 = arith.constant 0 : index
    %c12_28 = arith.constant 12 : index
    %c0_29 = arith.constant 0 : index
    %27 = vector.load %arg3[%c0_27, %c12_28, %c0_29] : memref<1x16x128xf32, #tpu.memory_space<vmem>>, vector<1x4x128xf32>
    %28 = vector.shape_cast %27 : vector<1x4x128xf32> to vector<4x128xf32>
    %29 = arith.addf %26, %28 : vector<4x128xf32>
    %c0_30 = arith.constant 0 : index
    %c12_31 = arith.constant 12 : index
    %c0_32 = arith.constant 0 : index
    %30 = vector.load %arg6[%c0_30, %c12_31, %c0_32] : memref<1x16x128xf32, #tpu.memory_space<vmem>>, vector<1x4x128xf32>
    %31 = vector.shape_cast %30 : vector<1x4x128xf32> to vector<4x128xf32>
    %32 = vector.shape_cast %29 : vector<4x128xf32> to vector<1x4x128xf32>
    tpu.vector_store %arg6[%c0_30, %c12_31, %c0_32], %32 {strides = array<i32>} : memref<1x16x128xf32, #tpu.memory_space<vmem>>, vector<1x4x128xf32>,
    return
  }
  func.func @transform_0(%arg0: i32, %arg1: i32) -> (i32, i32, i32) {
    %c0_i32 = arith.constant 0 : i32
    %c0_i32_0 = arith.constant 0 : i32
    return %arg0, %c0_i32, %arg1 : i32, i32, i32
  }
  func.func @transform_1(%arg0: i32, %arg1: i32) -> (i32, i32, i32) {
    %c0_i32 = arith.constant 0 : i32
    %c0_i32_0 = arith.constant 0 : i32
    return %arg0, %c0_i32, %arg1 : i32, i32, i32
  }
  func.func @transform_2(%arg0: i32, %arg1: i32) -> (i32, i32, i32) {
    %c0_i32 = arith.constant 0 : i32
    %c0_i32_0 = arith.constant 0 : i32
    return %arg0, %c0_i32, %arg1 : i32, i32, i32
  }
  func.func @transform_3(%arg0: i32, %arg1: i32) -> (i32, i32, i32) {
    %c0_i32 = arith.constant 0 : i32
    %c0_i32_0 = arith.constant 0 : i32
    return %arg0, %c0_i32, %arg1 : i32, i32, i32
  }
  func.func @transform_4(%arg0: i32, %arg1: i32) -> (i32, i32, i32) {
    %c0_i32 = arith.constant 0 : i32
    %c0_i32_0 = arith.constant 0 : i32
    return %arg0, %c0_i32, %arg1 : i32, i32, i32
  }
}

</mosaic_0001>

<bundles_post_ra>
// kernel: tpu_custom_call.1
= control target key start
LH: loop header
LB: loop body
LE: loop exit
PB: predicated region body
PF: predicated region fallthrough
CT: control target
= control target key end

     0   :  { %s1045_s0 = inlined_call_operand.vmem [shape: f32[2,16,256], index: 0, kind: input, shape index: {}]   ;;  %s1046_s1 = inlined_call_operand.hbm [shape: f32[2,16,256], index: 1, kind: input, shape index: {}]   ;;  %s1047_s2 = inlined_call_operand.vmem [shape: f32[2,12,256], index: 2, kind: input, shape index: {}]   ;;  %s1048_s3 = inlined_call_operand.vmem [shape: f32[2,8,256], index: 3, kind: input, shape index: {}]   ;;  %s1049_s4 = inlined_call_operand.hbm [shape: f32[2,16,256], index: 4, kind: output, shape index: {}]  }
   0x1   :  { %1052 = sst [smem:[#allocation11_spill]] %s1045_s0 }
   0x2   :  { %1053 = sst [smem:[#allocation12_spill]] %s1046_s1 }
   0x3   :  { %1054 = sst [smem:[#allocation13_spill]] %s1047_s2 }
   0x4   :  { %9 = vsyncpa [#allocation4], 0 }
   0x5   :  { %11 = vsyncpa [#allocation4 + $0x1], 0 }
   0x6   :  { %12 = vsyncpa [#allocation5], 0 }
   0x7   :  { %14 = vsyncpa [#allocation5 + $0x1], 0  ;;  %s832_s15 = smov 0   ;;  %s834_s16 = smov 0  }
   0x8   :  { %s836_s17 = smov 0   ;;  %s838_s18 = smov 0  }
   0x9   :  { %s840_s19 = smov 0   ;;  %s842_s20 = smov 0  }
   0xa   :  { %s844_s21 = smov 0   ;;  %s846_s22 = smov 0  }
   0xb LB: > { %s567_s23 = sadd.s32 4294967295, %s797_s22   ;;  %s568_s24 = sadd.s32 4294967294, %s797_s22   ;;  %s797_s22 = sphi %s846_s22, %s20_s22   ;;  %s793_s21 = sphi %s844_s21, %s1072_s21   ;;  %s789_s20 = sphi %s842_s20, %s1071_s20   ;;  %s785_s19 = sphi %s840_s19, %s1070_s19   ;;  %s781_s18 = sphi %s838_s18, %s1069_s18   ;;  %s777_s17 = sphi %s836_s17, %s1068_s17   ;;  %s773_s16 = sphi %s834_s16, %s1067_s16   ;;  %s769_s15 = sphi %s832_s15, %s1066_s15  }
   0xc   : > { %s29_s25 = sadd.s32 1, %s789_s20  ;;  %s32_s26 = sadd.s32 1, %s793_s21 }
   0xd   : > { %p30_p0 = scmp.ge.s32.totalorder %s29_s25, 2  ;;  %p48_p1 = scmp.ne.s32.totalorder %s777_s17, %s773_s16 }
   0xe   : > { %p49_p2 = scmp.eq.s32.totalorder %s797_s22, 0  ;;  %p82_p5 = scmp.ne.s32.totalorder %s773_s16, %s769_s15 }
   0xf   : > { %s1074_s25 = smov (%p30_p0, %s29_s25), 0  ;;  %s1076_s26 = smov (!%p30_p0, %s32_s26), %s793_s21 }
  0x10   : > { %s37_s27 = ssub.s32 %s789_s20, %s1074_s25  ;;  %p884_p3 = por %p49_p2, %p48_p1 }
  0x11   : > { %p34_p4 = scmp.ge.s32.totalorder %s1076_s26, 2  ;;  %p83_p6 = scmp.eq.s32.totalorder %s567_s23, 0 }
  0x12   : > { %p164_p7 = scmp.eq.s32.totalorder %s567_s23, 3  ;;  %p170_p10 = scmp.eq.s32.totalorder %s568_s24, 3 }
  0x13   : > { %s1078_s26 = smov (%p34_p4, %s1076_s26), 0  ;;  %p892_p8 = por %p83_p6, %p82_p5 }
  0x14   : > { %1056 = sst [smem:[#allocation10_spill]] %s1078_s26  ;;  %p896_p9 = por %p164_p7, %p48_p1 }
  0x15   : > { %s36_s5 = ssub.s32 %s793_s21, %s1078_s26  ;;  %s41_s7 = sadd.s32 1, %s777_s17 }
  0x16   : > { %s1058_s30 = scalar_select %p896_p9, 1, 0 }
  0x17   : > { %s38_s6 = sor.u32 %s37_s27, %s36_s5  ;;  %p903_p12 = por %p170_p10, %p82_p5 }
  0x18   : > { %p39_p11 = scmp.eq.s32.totalorder %s38_s6, 0  ;;  %p570_p13 = scmp.ge.s32.totalorder %s797_s22, 4 }
  0x19   : > { %s1059_s8 = scalar_select %p903_p12, 1, 0 }
  0x1a   : > { %s908_s9 = scalar_select %p39_p11, %s777_s17, %s41_s7  }
  0x1b   : > { %186 = sbr.rel (%p570_p13) target bundleno = 87 (0x57), region = 16 }
  0x22   : > { %189 = sbr.rel (!%p884_p3) target bundleno = 45 (0x2d), region = 20  ;;  %s191_s10 = sand.u32 (%p884_p3), 1, %s777_s17  }
  0x23   : > { %s572_s11 = sshll.u32 (%p884_p3), %s793_s21, 2  ;;  %s571_s12 = sshll.u32 (%p884_p3), %s191_s10, 4 }
  0x24   : > { %s195_s13 = sadd.s32 (%p884_p3), %s789_s20, %s572_s11  ;;  %s1060_s0 = sld [smem:[#allocation11_spill]] (%p884_p3) }
  0x25   : > { %s573_s14 = sshll.u32 (%p884_p3), %s195_s13, 3  ;;  %s193_s5 = scalar_lea.vmem (%p884_p3), [#allocation2], %s571_s12 }
  0x2a   : > { %s197_s27 = scalar_lea.vmem %s1060_s0, %s573_s14 }
  0x2b   : > { %v227_v0 = vld [vmem:[%s197_s27] sm:$0xff]  ;;  %v229_v1 = vld [vmem:[%s197_s27 + $0x10] sm:$0xff] }
  0x2c   : > { %228 = vst [vmem:[%s193_s5] sm:$0xff] %v227_v0  ;;  %230 = vst [vmem:[%s193_s5 + $0x8] sm:$0xff] %v229_v1 }
  0x2d PF: > { %s237_s6 = sand.u32 1, %s777_s17   ;;  %s575_s7 = sshll.u32 %s793_s21, 2 }
  0x2e   : > { %s921_s26 = sshll.u32 %s237_s6, 4  ;;  %s924_s10 = sadd.s32 %s789_s20, %s575_s7 }
  0x2f   : > { %s576_s11 = sshll.u32 %s924_s10, 7  ;;  %s241_s13 = scalar_lea.vmem [#allocation3], %s921_s26 }
  0x30   : > { %s249_s14 = sshll.u32 %s241_s13, 4  ;;  %s1061_s1 = sld [smem:[#allocation12_spill]]  ;;  %s933_s14 = int_to_ptr.vmem [resolvable:$true] %s249_s14 }
  0x31   : > { %s935_s27 = scalar_lea.sflag [#allocation4], %s237_s6 }
  0x36   : > { %s931_s24 = scalar_lea.hbm %s1061_s1, %s576_s11  ;;  %s675_s0 = scalar_lea.hbm %s1061_s1, 1024 }
  0x37   : > { %s671_s5 = scalar_lea.hbm %s931_s24, 256  ;;  %p676_p4 = scmp.lt.u32.totalorder %s931_s24, %s1061_s1 }
  0x38   : > { %p672_p0 = scmp.ne.s32.totalorder %s931_s24, %s671_s5  ;;  %p677_p5 = scmp.lt.u32.totalorder %s675_s0, %s671_s5 }
  0x39   : > { %p679_p7 = scmp.lt.u32.totalorder %s671_s5, %s931_s24 }
  0x3a   : > { %p673_p1 = pnand %p672_p0, %p884_p3  ;;  %p678_p6 = por %p677_p5, %p676_p4 }
  0x3c   : > { %p674_p2 = pneg %p673_p1  ;;  %p680_p10 = por %p679_p7, %p678_p6 }
  0x3e   : > { %p681_p11 = pnand %p680_p10, %p674_p2 }
  0x40   : > { %684 = shalt.err (!%p681_p11)
}
  0x41   : > { %s685_s6 = scalar_lea.vmem %s933_s14, 256  ;;  %s799_s12 = smov [#allocation3]  }
  0x42   : > { %p686_p13 = scmp.ne.s32.totalorder %s933_s14, %s685_s6  ;;  %s689_s7 = sshll.u32 %s799_s12, 4  ;;  %s690_s7 = int_to_ptr.vmem [resolvable:$false] %s689_s7 }
  0x43   : > { %s691_s13 = scalar_lea.vmem %s690_s7, 512  ;;  %p692_p12 = scmp.lt.s32.totalorder %s933_s14, %s690_s7 }
  0x44   : > { %p687_p0 = pnand %p686_p13, %p884_p3  ;;  %p693_p9 = scmp.lt.s32.totalorder %s691_s13, %s685_s6 }
  0x46   : > { %p688_p1 = pneg %p687_p0  ;;  %p694_p4 = por %p693_p9, %p692_p12 }
  0x48   : > { %p695_p5 = pnand %p694_p4, %p688_p1 }
  0x4a   : > { %698 = shalt.err (!%p695_p5)
}
  0x4b   : > { %s800_s0 = smov 256   ;;  %s801_s5 = smov 128  }
  0x4c   : > { %s802_s23 = smov 8   ;;  %258 = sbr.rel (!%p884_p3) target bundleno = 87 (0x57), region = 62 }
  0x4d   : > { %592 = dma.hbm_to_vmem [thread:$0]  (%p884_p3), %s931_s24, 256, %s933_s14, %s935_s27, %s800_s0, %s801_s5, %s802_s23  }
  0x4e   : > { %s579_s11 = sshll.u32 (%p884_p3), %s924_s10, 3  ;;  %s1062_s2 = sld [smem:[#allocation13_spill]] (%p884_p3) }
  0x4f   : > { %s262_s13 = scalar_lea.vmem (%p884_p3), [#allocation6], %s921_s26 }
  0x54   : > { %s266_s7 = scalar_lea.vmem %s1062_s2, %s579_s11 }
  0x55   : > { %v296_v2 = vld [vmem:[%s266_s7] sm:$0xff]  ;;  %v298_v3 = vld [vmem:[%s266_s7 + $0x10] sm:$0xff] }
  0x56   : > { %297 = vst [vmem:[%s262_s13] sm:$0xff] %v296_v2  ;;  %299 = vst [vmem:[%s262_s13 + $0x8] sm:$0xff] %v298_v3 }
  0x57 PF: > { %p580_p9 = scmp.ge.s32.totalorder %s797_s22, 1  ;;  %p315_p12 = scmp.lt.s32.totalorder %s797_s22, 5 }
  0x59   : > { %p316_p2 = pnand %p580_p9, %p315_p12 }
  0x5a   : > { %s969_s28 = sand.u32 (!%p316_p2), 1, %s773_s16  }
  0x5b   : > { %319 = sbr.rel (%p316_p2) target bundleno = 133 (0x85), region = 104  ;;  %s581_s10 = sshll.u32 (!%p316_p2), %s969_s28, 4 }
  0x5c   : > { %s324_s14 = scalar_lea.vmem (!%p316_p2), [#allocation2], %s581_s10  ;;  %s329_s24 = scalar_lea.sflag (!%p316_p2), [#allocation4], %s969_s28 }
  0x5d   : > { %s332_s26 = scalar_lea.vmem (!%p316_p2), [#allocation3], %s581_s10 }
  0x62   : > { %760 = dma.done.wait (%p892_p8), %s329_s24, 256  }
  0x63   : > { %762 = vsyncadd (%p892_p8), %s329_s24, 4294967040  ;;  %p380_p3 = scmp.lt.s32.totalorder %s785_s19, 1  ;;  %p382_p6 = scmp.lt.s32.totalorder %s781_s18, 1  ;;  %v388_v4 = vld [vmem:[%s324_s14] sm:$0xff]  ;;  %v396_v8 = vld [vmem:[%s324_s14 + $0x8] sm:$0xf] }
  0x64   : > { %s379_s23 = scalar_lea.vmem [#allocation7], %s581_s10  ;;  %s588_s6 = sshll.u32 %s785_s19, 2  ;;  %v389_v5 = vld [vmem:[%s332_s26] sm:$0xff]  ;;  %v397_v9 = vld [vmem:[%s332_s26 + $0x8] sm:$0xf] }
  0x65   : > { %s381_s27 = scalar_select %p380_p3, %s785_s19, 1  ;;  %v390_v7 = vadd.f32 %v389_v5, %v388_v4  ;;  %v398_v12 = vadd.f32 %v397_v9, %v396_v8  ;;  %v402_v13 = vld [vmem:[%s324_s14 + $0xc] sm:$0xf] }
  0x66   : > { %s383_s0 = scalar_select %p382_p6, %s781_s18, 1  ;;  %v403_v14 = vld [vmem:[%s332_s26 + $0xc] sm:$0xf] }
  0x67   : > { %s585_s5 = sshll.u32 %s381_s27, 1  ;;  %s421_s11 = sshll.u32 %s379_s23, 4  ;;  %v404_v16 = vadd.f32 %v403_v14, %v402_v13  ;;  %s986_s11 = int_to_ptr.vmem [resolvable:$true] %s421_s11 }
  0x68   : > { %s385_s12 = sadd.s32 %s585_s5, %s383_s0  ;;  %s340_s29 = scalar_lea.vmem [#allocation6], %s581_s10 }
  0x69   : > { %s586_s7 = sshll.u32 %s385_s12, 3  ;;  %v391_v6 = vld [vmem:[%s340_s29] sm:$0xff]  ;;  %s418_s13 = sadd.s32 %s781_s18, %s588_s6  ;;  %v399_v10 = vld [vmem:[%s340_s29 + $0x8] sm:$0xf]  ;;  %405 = vst [vmem:[%s379_s23 + $0xc] sm:$0xf] %v404_v16 }
  0x6a   : > { %s387_s2 = scalar_lea.vmem %s1048_s3, %s586_s7  ;;  %s589_s19 = sshll.u32 %s418_s13, 7  ;;  %v392_v15 = vadd.f32 %v391_v6, %v390_v7  ;;  %v400_v17 = vadd.f32 %v399_v10, %v398_v12 }
  0x6b   : > { %v393_v11 = vld [vmem:[%s387_s2] sm:$0xff]  ;;  %s991_s10 = scalar_lea.hbm %s1049_s4, %s589_s19  ;;  %s407_s2 = scalar_lea.sflag [#allocation5], %s969_s28 }
  0x6c   : > { %v394_v18 = vadd.f32 %v393_v11, %v392_v15  ;;  %401 = vst [vmem:[%s379_s23 + $0x8] sm:$0xf] %v400_v17  ;;  %s699_s14 = scalar_lea.vmem %s986_s11, 256  ;;  %p1063_p7 = scmp.ne.s32.totalorder %s1058_s30, 0 }
  0x6d   : > { %p700_p8 = scmp.ne.s32.totalorder %s986_s11, %s699_s14  ;;  %s803_s26 = smov [#allocation7]  }
  0x6e   : > { %395 = vst [vmem:[%s379_s23] sm:$0xff] %v394_v18  ;;  %s703_s27 = sshll.u32 %s803_s26, 4  ;;  %s704_s27 = int_to_ptr.vmem [resolvable:$false] %s703_s27 }
  0x6f   : > { %p701_p10 = pnand %p700_p8, %p1063_p7  ;;  %s705_s0 = scalar_lea.vmem %s704_s27, 512 }
  0x70   : > { %p706_p13 = scmp.lt.s32.totalorder %s986_s11, %s704_s27  ;;  %p707_p0 = scmp.lt.s32.totalorder %s705_s0, %s699_s14 }
  0x71   : > { %p702_p11 = pneg %p701_p10 }
  0x72   : > { %p708_p1 = por %p707_p0, %p706_p13 }
  0x74   : > { %p709_p4 = pnand %p708_p1, %p702_p11 }
  0x76   : > { %712 = shalt.err (!%p709_p4)
}
  0x77   : > { %s713_s5 = scalar_lea.hbm %s991_s10, 256  ;;  %s717_s6 = scalar_lea.hbm %s1049_s4, 1024 }
  0x78   : > { %p714_p5 = scmp.ne.s32.totalorder %s991_s10, %s713_s5  ;;  %p718_p2 = scmp.lt.u32.totalorder %s991_s10, %s1049_s4 }
  0x79   : > { %p719_p3 = scmp.lt.u32.totalorder %s717_s6, %s713_s5  ;;  %p721_p8 = scmp.lt.u32.totalorder %s713_s5, %s991_s10 }
  0x7a   : > { %p715_p9 = pnand %p714_p5, %p1063_p7 }
  0x7b   : > { %p720_p6 = por %p719_p3, %p718_p2 }
  0x7c   : > { %p716_p12 = pneg %p715_p9 }
  0x7d   : > { %p722_p10 = por %p721_p8, %p720_p6 }
  0x7f   : > { %p723_p11 = pnand %p722_p10, %p716_p12 }
  0x81   : > { %726 = shalt.err (!%p723_p11)
}
  0x82   : > { %s804_s13 = smov 128   ;;  %s805_s24 = smov 256  }
  0x83   : > { %s806_s19 = smov 8  }
  0x84   : > { %594 = dma.vmem_to_hbm [thread:$0]  (%p1063_p7), %s986_s11, 256, %s991_s10, %s407_s2, %s804_s13, %s805_s24, %s806_s19  }
  0x85 PF: > { %p600_p13 = scmp.ge.s32.totalorder %s797_s22, 2  ;;  %s436_s1 = sand.u32 1, %s769_s15  }
  0x86   : > { %p1064_p0 = scmp.ne.s32.totalorder %s1059_s8, 0  ;;  %s437_s18 = scalar_lea.sflag [#allocation5], %s436_s1 }
  0x88   : > { %p597_p1 = pnand %p600_p13, %p1064_p0 }
  0x8a   : > { %764 = dma.done.wait (!%p597_p1), %s437_s18, 256  }
  0x8b   : > { %766 = vsyncadd (!%p597_p1), %s437_s18, 4294967040  ;;  %s20_s22 = sadd.s32 1, %s797_s22   ;;  %s1065_s30 = sld [smem:[#allocation10_spill]] }
  0x8c   : > { %p17_p4 = scmp.ge.s32.totalorder %s20_s22, 6   ;;  %s1066_s15 = smov %s773_s16 }
  0x8d   : > { %s1067_s16 = smov %s777_s17  ;;  %s1068_s17 = smov %s908_s9 }
  0x8e   : > { %s1069_s18 = smov %s789_s20  ;;  %s1070_s19 = smov %s793_s21 }
  0x8f   : > { %s1071_s20 = smov %s1074_s25  ;;  %19 = sbr.rel (!%p17_p4) target bundleno = 11 (0xb), region = 176 }
  0x91   : > { %s1072_s21 = smov %s1065_s30 }
  0x96   :  { %442 = vsyncpa [#allocation4], 1 }
  0x97   :  { %444 = vsyncpa [#allocation4 + $0x1], 1 }
  0x98   :  { %445 = vsyncpa [#allocation5], 1 }
  0x99   :  { %447 = vsyncpa [#allocation5 + $0x1], 1 }

</bundles_post_ra>
